<compile_context>
chip_gen: v5e
topology: v5e:2x2
jax: 0.10.0
libtpu: 0.0.40
codegen_flags: <defaults>
</compile_context>

<pallas_src>
import jax
import jax.numpy as jnp
from jax import lax
from jax.experimental import pallas as pl
from jax.experimental.pallas import tpu as pltpu

IN_FEATURES = 103
OUT_FEATURES = 64
DEFAULT_TILE_N = 512          # 512-2048 is the near-roofline sweet spot
SMALL_BATCH_THRESHOLD = 256   # below this, pure-JAX fused path wins


def _linear_relu_kernel(x_ref, w_ref, b_ref, o_ref):
    # x_ref : (TILE_N, 103)  VMEM  -- one batch tile
    # w_ref : (64, 103)      VMEM  -- PyTorch Linear layout, resident
    # b_ref : (1, 64)        VMEM  -- resident
    # o_ref : (TILE_N, 64)   VMEM
    y = lax.dot_general(
        x_ref[...], w_ref[...],
        dimension_numbers=(((1,), (1,)), ((), ())),   # contract x.K with w.K
        preferred_element_type=jnp.float32,
    )
    y = y + b_ref[...]                                # broadcast bias over rows
    # Dropout(p=0.1) in eval mode == identity.
    o_ref[...] = jnp.maximum(y, 0.0).astype(o_ref.dtype)


def _round_up(x, m):
    return ((x + m - 1) // m) * m


def old_front_model_forward(x, weight, bias, *, tile_n=DEFAULT_TILE_N,
                            force_kernel=False):
    """x: (N, 103) f32; weight: (64, 103) f32; bias: (64,) f32 -> (N, 64) f32."""
    n = x.shape[0]

    # Small-batch fast path: launch + DMA setup dominates a <1us matmul.
    if n < SMALL_BATCH_THRESHOLD and not force_kernel:
        return jnp.maximum(x @ weight.T + bias[None, :], 0.0).astype(x.dtype)

    # Tile the batch axis; keep the sublane dim a multiple of 8.
    tile_n = min(tile_n, _round_up(n, 8))
    grid = (pl.cdiv(n, tile_n),)
    b2 = bias.reshape(1, OUT_FEATURES)

    return pl.pallas_call(
        _linear_relu_kernel,
        out_shape=jax.ShapeDtypeStruct((n, OUT_FEATURES), x.dtype),
        grid_spec=pltpu.PrefetchScalarGridSpec(
            num_scalar_prefetch=0,
            grid=grid,
            in_specs=[
                # x: one (tile_n, 103) row-block per grid step (pipelined).
                pl.BlockSpec((tile_n, IN_FEATURES), lambda i: (i, 0)),
                # weight / bias: same block every step -> stay resident in VMEM.
                pl.BlockSpec((OUT_FEATURES, IN_FEATURES), lambda i: (0, 0)),
                pl.BlockSpec((1, OUT_FEATURES), lambda i: (0, 0)),
            ],
            out_specs=pl.BlockSpec((tile_n, OUT_FEATURES), lambda i: (i, 0)),
        ),
        compiler_params=pltpu.CompilerParams(
            # Independent batch tiles: shard across TensorCores on v7x.
            dimension_semantics=("parallel",),
        ),
    )(x, weight, b2)


def _reference_forward(x, weight, bias):
    # Pure-JAX reference (eval-mode dropout == identity).
    return jnp.maximum(x @ weight.T + bias[None, :], 0.0)


if __name__ == "__main__":
    key = jax.random.PRNGKey(0)
    k_x, k_w, k_b, k_x2 = jax.random.split(key, 4)

    # Deterministic parameter init (mimics nn.Linear's uniform(-1/sqrt(fan_in), +)).
    bound = 1.0 / (IN_FEATURES ** 0.5)
    weight = jax.random.uniform(
        k_w, (OUT_FEATURES, IN_FEATURES), dtype=jnp.float32,
        minval=-bound, maxval=bound)
    bias = jax.random.uniform(
        k_b, (OUT_FEATURES,), dtype=jnp.float32, minval=-bound, maxval=bound)

    # Small spec-consistent batch: force the Pallas kernel path (single tile).
    batch_small = 8
    x_small = jax.random.normal(k_x, (batch_small, IN_FEATURES), dtype=jnp.float32)
    out_small = jax.block_until_ready(
        old_front_model_forward(x_small, weight, bias, force_kernel=True))
    ref_small = _reference_forward(x_small, weight, bias)
    assert out_small.shape == (batch_small, OUT_FEATURES)
    assert jnp.allclose(out_small, ref_small, atol=1e-4, rtol=1e-4)

    # Larger batch (non-multiple of the tile) to exercise the tiled, pipelined
    # grid including a partial final block.
    batch_big = 1544  # 3 full 512-row tiles + one 8-row partial tile
    x_big = jax.random.normal(k_x2, (batch_big, IN_FEATURES), dtype=jnp.float32)
    out_big = jax.block_until_ready(
        old_front_model_forward(x_big, weight, bias))
    ref_big = _reference_forward(x_big, weight, bias)
    assert out_big.shape == (batch_big, OUT_FEATURES)
    assert jnp.allclose(out_big, ref_big, atol=1e-4, rtol=1e-4)

    print("KERNEL_OK")
</pallas_src>

<mosaic_0001>
module attributes {stable_mosaic.version = 11 : i64} {
  func.func @_linear_relu_kernel(%arg0: i32, %arg1: memref<8x103xf32, #tpu.memory_space<vmem>>, %arg2: memref<64x103xf32, #tpu.memory_space<vmem>>, %arg3: memref<1x64xf32, #tpu.memory_space<vmem>>, %arg4: memref<8x64xf32, #tpu.memory_space<vmem>>) attributes {dimension_semantics = [#tpu.dimension_semantics<parallel>], iteration_bounds = array<i64: 1>, scalar_prefetch = 0 : i64, scratch_operands = 0 : i64, tpu.core_type = #tpu.core_type<tc>, window_params = [{transform_indices = @transform_0, window_bounds = array<i64: 8, 103>}, {pipeline_mode = #tpu.pipeline_mode<synchronous>, transform_indices = @transform_1, window_bounds = array<i64: 64, 103>}, {pipeline_mode = #tpu.pipeline_mode<synchronous>, transform_indices = @transform_2, window_bounds = array<i64: 1, 64>}, {transform_indices = @transform_3, window_bounds = array<i64: 8, 64>}]} {
    %c0 = arith.constant 0 : index
    %c0_0 = arith.constant 0 : index
    %0 = vector.load %arg1[%c0, %c0_0] : memref<8x103xf32, #tpu.memory_space<vmem>>, vector<8x103xf32>
    %c0_1 = arith.constant 0 : index
    %c0_2 = arith.constant 0 : index
    %1 = vector.load %arg2[%c0_1, %c0_2] : memref<64x103xf32, #tpu.memory_space<vmem>>, vector<64x103xf32>
    %cst = arith.constant dense<0.000000e+00> : vector<8x64xf32>
    %2 = tpu.matmul %0, %1, %cst {dimension_numbers = #tpu.dot_dimension_numbers<[1], [1], [0], [0], [0, 0, 1, 0], [], []>} : vector<8x103xf32>, vector<64x103xf32>, vector<8x64xf32> -> vector<8x64xf32>
    %c0_3 = arith.constant 0 : index
    %c0_4 = arith.constant 0 : index
    %3 = vector.load %arg3[%c0_3, %c0_4] : memref<1x64xf32, #tpu.memory_space<vmem>>, vector<1x64xf32>
    %4 = vector.broadcast %3 : vector<1x64xf32> to vector<8x64xf32>
    %5 = arith.addf %2, %4 : vector<8x64xf32>
    %cst_5 = arith.constant 0.000000e+00 : f32
    %6 = vector.broadcast %cst_5 : f32 to vector<8x64xf32>
    %7 = arith.maximumf %5, %6 : vector<8x64xf32>
    %c0_6 = arith.constant 0 : index
    %c0_7 = arith.constant 0 : index
    %8 = vector.load %arg4[%c0_6, %c0_7] : memref<8x64xf32, #tpu.memory_space<vmem>>, vector<8x64xf32>
    tpu.vector_store %arg4[%c0_6, %c0_7], %7 {strides = array<i32>} : memref<8x64xf32, #tpu.memory_space<vmem>>, vector<8x64xf32>,
    return
  }
  func.func @transform_0(%arg0: i32) -> (i32, i32) {
    %c0_i32 = arith.constant 0 : i32
    %c0_i32_0 = arith.constant 0 : i32
    return %arg0, %c0_i32 : i32, i32
  }
  func.func @transform_1(%arg0: i32) -> (i32, i32) {
    %c0_i32 = arith.constant 0 : i32
    %c0_i32_0 = arith.constant 0 : i32
    %c0_i32_1 = arith.constant 0 : i32
    return %c0_i32, %c0_i32_0 : i32, i32
  }
  func.func @transform_2(%arg0: i32) -> (i32, i32) {
    %c0_i32 = arith.constant 0 : i32
    %c0_i32_0 = arith.constant 0 : i32
    %c0_i32_1 = arith.constant 0 : i32
    return %c0_i32, %c0_i32_0 : i32, i32
  }
  func.func @transform_3(%arg0: i32) -> (i32, i32) {
    %c0_i32 = arith.constant 0 : i32
    %c0_i32_0 = arith.constant 0 : i32
    return %arg0, %c0_i32 : i32, i32
  }
}

</mosaic_0001>

<bundles_post_ra>
// kernel: tpu_custom_call.1
= control target key start
LH: loop header
LB: loop body
LE: loop exit
PB: predicated region body
PF: predicated region fallthrough
CT: control target
= control target key end

     0   :  { %8 = vsyncpa [#allocation3], 0  ;;  %s266_s0 = inlined_call_operand.hbm [shape: f32[8,103], index: 0, kind: input, shape index: {}]   ;;  %s267_s1 = inlined_call_operand.hbm [shape: f32[64,103], index: 1, kind: input, shape index: {}]   ;;  %s268_s2 = inlined_call_operand.vmem [shape: f32[1,64], index: 2, kind: input, shape index: {}]   ;;  %s269_s3 = inlined_call_operand.hbm [shape: f32[8,64], index: 3, kind: output, shape index: {}]  }
   0x1   :  { %9 = vsyncpa [#allocation6], 0 }
   0x2   :  { %10 = vsyncpa [#allocation4], 0  ;;  %s16_s14 = sshll.u32 %s266_s0, 4  ;;  %s220_s15 = smov [#allocation2]   ;;  %s17_s14 = int_to_ptr.hbm [resolvable:$true] %s16_s14 }
   0x3   :  { %s18_s16 = sshll.u32 %s220_s15, 4  ;;  %s26_s19 = sshll.u32 %s267_s1, 4  ;;  %s19_s16 = int_to_ptr.vmem [resolvable:$true] %s18_s16  ;;  %s27_s19 = int_to_ptr.hbm [resolvable:$true] %s26_s19 }
   0x4   :  { %21 = dma.hbm_to_vmem [thread:$0]  %s17_s14, 128, %s19_s16, [#allocation3]  }
   0x5   :  { %s221_s20 = smov [#allocation5]   ;;  %s222_s22 = smov 128  }
   0x6   :  { %s28_s21 = sshll.u32 %s221_s20, 4  ;;  %s223_s23 = smov 8   ;;  %s29_s21 = int_to_ptr.vmem [resolvable:$true] %s28_s21 }
   0x7   :  { %34 = dma.hbm_to_vmem [thread:$0]  %s27_s19, 1024, %s29_s21, [#allocation6], %s222_s22, %s222_s22, %s223_s23  }
   0x8   :  { %214 = dma.done.wait [#allocation3], 128  }
   0x9   :  { %215 = vsyncadd [#allocation3], 4294967168 }
   0xa   :  { %216 = dma.done.wait [#allocation6], 1024  }
   0xb   :  { %217 = vsyncadd [#allocation6], 4294966272  ;;  %vm58_vm0 = vcmask 842752   ;;  %v53_v0 = vld [vmem:[#allocation5 + $0x38] sm:$0xff]  ;;  %v52_v1 = vld [vmem:[#allocation5 + $0x30] sm:$0xff]  ;;  %s224_s24 = smov [#allocation7]  }
   0xc   :  { %127 = vmatpush.xpose.msk.msra.mxu0 %vm58_vm0, %v53_v0  ;;  %v51_v2 = vld [vmem:[#allocation5 + $0x28] sm:$0xff]  ;;  %v50_v3 = vld [vmem:[#allocation5 + $0x20] sm:$0xff]  ;;  %v49_v4 = vld [vmem:[#allocation5 + $0x18] sm:$0xff]  ;;  %s114_s25 = sshll.u32 %s224_s24, 4  ;;  %s116_s28 = sshll.u32 %s269_s3, 4  ;;  %vm107_vm1 = vcmask 523264   ;;  %s115_s25 = int_to_ptr.vmem [resolvable:$true] %s114_s25  ;;  %s117_s28 = int_to_ptr.hbm [resolvable:$true] %s116_s28 }
   0xd   :  { %v48_v5 = vld [vmem:[#allocation5 + $0x10] sm:$0xff]  ;;  %v47_v6 = vld [vmem:[#allocation5 + $0x8] sm:$0xff]  ;;  %v46_v7 = vld [vmem:[#allocation5] sm:$0xff] }
   0xe   :  { %v45_v8 = vld [vmem:[#allocation2] sm:$0xff] }
   0xf   :  { %v141_v9 = vld [vmem:[%s268_s2] ss:$0 sm:$0xff] }
  0x10   :  { %128 = vmatpush.xpose.msk.msra.mxu0 %vm58_vm0, %v52_v1 }
  0x14   :  { %129 = vmatpush.xpose.msk.msra.mxu0 %vm58_vm0, %v51_v2 }
  0x18   :  { %130 = vmatpush.xpose.msk.msra.mxu0 %vm58_vm0, %v50_v3 }
  0x1c   :  { %131 = vmatpush.xpose.msk.msra.mxu0 %vm58_vm0, %v49_v4 }
  0x20   :  { %132 = vmatpush.xpose.msk.msra.mxu0 %vm58_vm0, %v48_v5 }
  0x24   :  { %133 = vmatpush.xpose.msk.msra.mxu0 %vm58_vm0, %v47_v6 }
  0x28   :  { %134 = vmatpush.xpose.msk.msra.mxu0 %vm58_vm0, %v46_v7 }
  0x2b   :  { %135 = vmatmul.msk.f32.vlgmr.msra.gmra.mxu0 %vm58_vm0, %v45_v8 }
  0xa8   :  { %v103_v10 = vpop.f32.mrf.mxu0 }
  0xa9   :  { %v104_v11 = vadd.f32 %v141_v9, %v103_v10 }
  0xab   :  { %v106_v12 = vmax.f32 %v104_v11, 0.0 }
  0xad   :  { %108 = vst.msk [vmem:[#allocation7] sm:$0xff] %vm107_vm1, %v106_v12 }
  0xae   :  { %119 = dma.vmem_to_hbm [thread:$0]  %s115_s25, 128, %s117_s28, [#allocation4]  }
  0xaf   :  { %218 = dma.done.wait [#allocation4], 128  }
  0xb0   :  { %219 = vsyncadd [#allocation4], 4294967168 }
  0xb1   :  { %124 = vsyncpa [#allocation3], 1 }
  0xb2   :  { %125 = vsyncpa [#allocation6], 1 }
  0xb3   :  { %126 = vsyncpa [#allocation4], 1 }

</bundles_post_ra>
